<compile_context>
chip_gen: v6e
topology: v6e:2x2x1
jax: 0.10.0
libtpu: 0.0.40
codegen_flags: <defaults>
</compile_context>

<pallas_src>
import functools
import math

import jax
import jax.numpy as jnp
from jax.experimental import pallas as pl
from jax.experimental.pallas import tpu as pltpu


def _stprnn_kernel(x_ref, synx0_ref, h0_ref, wih_ref, whh_ref, b_ref,
                   lw_ref, lb_ref,
                   out_ref, hid_ref, cat_ref,
                   *, inv_tau, syn_u, seq_len):
    # x_ref:     (T, Bp, D)   inputs, time-major (Bp = batch padded to 8)
    # synx0_ref: (Bp, D)      initial syn_x (ones)
    # h0_ref:    (Bp, H)      initial hidden (zeros)
    # wih_ref:   (2D, H)  whh_ref: (H, H)  b_ref: (1, H)
    # lw_ref:    (H, 1)   lb_ref: (1, 1)
    # out_ref:   (T, Bp, 1)  hid_ref: (T, Bp, H)  cat_ref: (T, Bp, 2D)
    T = seq_len
    x = x_ref[...]                                   # (T, Bp, D)
    Bp = x.shape[1]
    H = whh_ref.shape[0]

    # ---- short-term plasticity (vectorized over all timesteps) ------------
    # syn_t = (1/k_{t-1}) * (inv_tau - (inv_tau - syn_{t-1} k_{t-1}) e_{t-1})
    #       = A_{t-1} + e_{t-1} * syn_{t-1},   with A_j = (inv_tau/k_j)(1-e_j)
    k = inv_tau + syn_u * x                          # (T, Bp, D)
    e = jnp.exp(-k)                                  # one batched EUP pass
    a = (inv_tau / k) * (1.0 - e)

    syn = synx0_ref[...]                             # (Bp, D), t = 0 (peeled)
    syn_steps = [syn]
    for t in range(1, T):                            # short affine scan, unrolled
        syn = a[t - 1] + e[t - 1] * syn
        syn_steps.append(syn)
    syn_all = jnp.stack(syn_steps, axis=0)           # (T, Bp, D)

    # ---- concatenated inputs [x, syn * x]: one lane-dense (2D=128) store ---
    cat = jnp.concatenate([x, syn_all * x], axis=-1)  # (T, Bp, 2D)
    cat_ref[...] = cat

    # ---- input projection + bias hoisted out of the recurrence ------------
    proj = jnp.dot(cat.reshape(T * Bp, cat.shape[-1]), wih_ref[...],
                   preferred_element_type=jnp.float32) + b_ref[...]
    proj = proj.reshape(T, Bp, H)                     # (T, Bp, H)

    # ---- hidden recurrence: only h @ W_hh + relu on the serial path -------
    whh = whh_ref[...]
    h = h0_ref[...]                                   # (Bp, H)
    hs = []
    for t in range(T):                                # unrolled (T static)
        h = jnp.maximum(
            proj[t] + jnp.dot(h, whh, preferred_element_type=jnp.float32),
            0.0)
        hs.append(h)
    hid = jnp.stack(hs, axis=0)                       # (T, Bp, H)
    hid_ref[...] = hid                                # single block store

    # ---- readout hoisted out of the loop: one matmul ------------------------
    out = jnp.dot(hid.reshape(T * Bp, H), lw_ref[...],
                  preferred_element_type=jnp.float32) + lb_ref[...]
    out_ref[...] = out.reshape(T, Bp, 1)


def stprnn_forward(x, syn_x0, h0, weight_ih, weight_hh, bias, lin_w, lin_b,
                   *, syn_tau=6.0, syn_u=0.5):
    """x: (B, T, D) f32. Returns (output (B,T,1), hidden (B,T,H), inputs_cat (B,T,2D))."""
    B, T, D = x.shape
    H = weight_ih.shape[1]

    # Pad batch to the f32 sublane granularity so every vreg/store is full.
    Bp = ((B + 7) // 8) * 8
    pad = Bp - B
    x_p = jnp.pad(x, ((0, pad), (0, 0), (0, 0)))
    syn_p = jnp.pad(syn_x0, ((0, pad), (0, 0)), constant_values=1.0)
    h0_p = jnp.pad(h0, ((0, pad), (0, 0)))

    x_tm = jnp.transpose(x_p, (1, 0, 2))           # (T, Bp, D), time-major
    bias2 = bias.reshape(1, H)
    lin_b2 = lin_b.reshape(1, 1)

    kernel = functools.partial(
        _stprnn_kernel,
        inv_tau=float(1.0 / syn_tau),
        syn_u=float(syn_u),
        seq_len=T,
    )

    vmem = pl.BlockSpec(memory_space=pltpu.MemorySpace.VMEM)

    out_t, hid_t, cat_t = pl.pallas_call(
        kernel,
        out_shape=(
            jax.ShapeDtypeStruct((T, Bp, 1), jnp.float32),
            jax.ShapeDtypeStruct((T, Bp, H), jnp.float32),
            jax.ShapeDtypeStruct((T, Bp, 2 * D), jnp.float32),
        ),
        in_specs=[vmem] * 8,
        out_specs=(vmem, vmem, vmem),
    )(x_tm, syn_p, h0_p, weight_ih, weight_hh, bias2, lin_w, lin_b2)

    # Back to the PyTorch (batch, seq, feature) layout; drop batch padding.
    # (Trivial at these sizes; return time-major directly when B*T is large.)
    output = jnp.transpose(out_t, (1, 0, 2))[:B]
    hidden = jnp.transpose(hid_t, (1, 0, 2))[:B]
    inputs_cat = jnp.transpose(cat_t, (1, 0, 2))[:B]
    return output, hidden, inputs_cat


def stprnn_reference(x, syn_x0, h0, weight_ih, weight_hh, bias, lin_w, lin_b,
                     *, syn_tau=6.0, syn_u=0.5):
    """Pure-JAX re-statement of the PyTorch forward (noise disabled)."""
    B, T, D = x.shape
    inv_tau = 1.0 / syn_tau
    k = inv_tau + syn_u * x
    syn = syn_x0
    syn_list = [syn]
    for i in range(T - 1):
        ki = k[:, i]
        syn = (1.0 / ki) * (inv_tau - (inv_tau - syn * ki) * jnp.exp(-ki))
        syn_list.append(syn)
    input_syn = jnp.stack(syn_list, axis=1)
    cat = jnp.concatenate([x, input_syn * x], axis=2)
    h = h0
    hs = []
    for i in range(T):
        h = jnp.maximum(cat[:, i] @ weight_ih + h @ weight_hh + bias, 0.0)
        hs.append(h)
    hidden = jnp.stack(hs, axis=1)
    output = hidden @ lin_w + lin_b
    return output, hidden, cat


if __name__ == "__main__":
    # Module defaults: input_dim=64, hidden_dim=16, syn_tau=6, syn_u=0.5
    B, T, D, H = 2, 8, 64, 16
    syn_tau, syn_u = 6.0, 0.5

    key = jax.random.PRNGKey(0)
    k_x, k_ih, k_hh, k_b, k_lw, k_lb = jax.random.split(key, 6)

    stdv = 1.0 / math.sqrt(H)
    weight_ih = jax.random.uniform(k_ih, (2 * D, H), jnp.float32, -stdv, stdv)
    weight_hh = jax.random.uniform(k_hh, (H, H), jnp.float32, -stdv, stdv)
    bias = jax.random.uniform(k_b, (H,), jnp.float32, -stdv, stdv)
    lin_w = jax.random.uniform(k_lw, (H, 1), jnp.float32, -stdv, stdv)
    lin_b = jax.random.uniform(k_lb, (1,), jnp.float32, -stdv, stdv)

    x = jax.random.uniform(k_x, (B, T, D), jnp.float32, 0.0, 1.0)
    syn_x0 = jnp.ones((B, D), jnp.float32)     # init_syn_x
    h0 = jnp.zeros((B, H), jnp.float32)        # init_hidden (squeezed leading 1)

    out, hid, cat = stprnn_forward(
        x, syn_x0, h0, weight_ih, weight_hh, bias, lin_w, lin_b,
        syn_tau=syn_tau, syn_u=syn_u)
    jax.block_until_ready((out, hid, cat))

    out_r, hid_r, cat_r = stprnn_reference(
        x, syn_x0, h0, weight_ih, weight_hh, bias, lin_w, lin_b,
        syn_tau=syn_tau, syn_u=syn_u)

    assert out.shape == (B, T, 1) and hid.shape == (B, T, H) and cat.shape == (B, T, 2 * D)
    assert jnp.allclose(out, out_r, atol=1e-5, rtol=1e-5)
    assert jnp.allclose(hid, hid_r, atol=1e-5, rtol=1e-5)
    assert jnp.allclose(cat, cat_r, atol=1e-5, rtol=1e-5)

    print("KERNEL_OK")
</pallas_src>

<mosaic_0001>
module attributes {stable_mosaic.version = 11 : i64} {
  func.func @_stprnn_kernel(%arg0: memref<8x8x64xf32, #tpu.memory_space<vmem>>, %arg1: memref<8x64xf32, #tpu.memory_space<vmem>>, %arg2: memref<8x16xf32, #tpu.memory_space<vmem>>, %arg3: memref<128x16xf32, #tpu.memory_space<vmem>>, %arg4: memref<16x16xf32, #tpu.memory_space<vmem>>, %arg5: memref<1x16xf32, #tpu.memory_space<vmem>>, %arg6: memref<16x1xf32, #tpu.memory_space<vmem>>, %arg7: memref<1x1xf32, #tpu.memory_space<vmem>>, %arg8: memref<8x8x1xf32, #tpu.memory_space<vmem>>, %arg9: memref<8x8x16xf32, #tpu.memory_space<vmem>>, %arg10: memref<8x8x128xf32, #tpu.memory_space<vmem>>) attributes {dimension_semantics = [], scalar_prefetch = 0 : i64, scratch_operands = 0 : i64, tpu.core_type = #tpu.core_type<tc>} {
    %c0 = arith.constant 0 : index
    %c0_0 = arith.constant 0 : index
    %c0_1 = arith.constant 0 : index
    %0 = vector.load %arg0[%c0, %c0_0, %c0_1] : memref<8x8x64xf32, #tpu.memory_space<vmem>>, vector<8x8x64xf32>
    %cst = arith.constant 5.000000e-01 : f32
    %1 = vector.broadcast %cst : f32 to vector<8x8x64xf32>
    %2 = arith.mulf %1, %0 : vector<8x8x64xf32>
    %cst_2 = arith.constant 0.166666672 : f32
    %3 = vector.broadcast %cst_2 : f32 to vector<8x8x64xf32>
    %4 = arith.addf %3, %2 : vector<8x8x64xf32>
    %cst_3 = arith.constant 0.000000e+00 : f32
    %5 = vector.broadcast %cst_3 : f32 to vector<8x8x64xf32>
    %6 = arith.subf %5, %4 : vector<8x8x64xf32>
    %7 = math.exp %6 : vector<8x8x64xf32>
    %cst_4 = arith.constant 0.166666672 : f32
    %8 = vector.broadcast %cst_4 : f32 to vector<8x8x64xf32>
    %9 = arith.divf %8, %4 : vector<8x8x64xf32>
    %cst_5 = arith.constant 1.000000e+00 : f32
    %10 = vector.broadcast %cst_5 : f32 to vector<8x8x64xf32>
    %11 = arith.subf %10, %7 : vector<8x8x64xf32>
    %12 = arith.mulf %9, %11 : vector<8x8x64xf32>
    %c0_6 = arith.constant 0 : index
    %c0_7 = arith.constant 0 : index
    %13 = vector.load %arg1[%c0_6, %c0_7] : memref<8x64xf32, #tpu.memory_space<vmem>>, vector<8x64xf32>
    %14 = vector.extract_strided_slice %12 {offsets = [0, 0, 0], sizes = [1, 8, 64], strides = [1, 1, 1]} : vector<8x8x64xf32> to vector<1x8x64xf32>
    %15 = vector.shape_cast %14 : vector<1x8x64xf32> to vector<8x64xf32>
    %16 = vector.extract_strided_slice %7 {offsets = [0, 0, 0], sizes = [1, 8, 64], strides = [1, 1, 1]} : vector<8x8x64xf32> to vector<1x8x64xf32>
    %17 = vector.shape_cast %16 : vector<1x8x64xf32> to vector<8x64xf32>
    %18 = arith.mulf %17, %13 : vector<8x64xf32>
    %19 = arith.addf %15, %18 : vector<8x64xf32>
    %20 = vector.extract_strided_slice %12 {offsets = [1, 0, 0], sizes = [1, 8, 64], strides = [1, 1, 1]} : vector<8x8x64xf32> to vector<1x8x64xf32>
    %21 = vector.shape_cast %20 : vector<1x8x64xf32> to vector<8x64xf32>
    %22 = vector.extract_strided_slice %7 {offsets = [1, 0, 0], sizes = [1, 8, 64], strides = [1, 1, 1]} : vector<8x8x64xf32> to vector<1x8x64xf32>
    %23 = vector.shape_cast %22 : vector<1x8x64xf32> to vector<8x64xf32>
    %24 = arith.mulf %23, %19 : vector<8x64xf32>
    %25 = arith.addf %21, %24 : vector<8x64xf32>
    %26 = vector.extract_strided_slice %12 {offsets = [2, 0, 0], sizes = [1, 8, 64], strides = [1, 1, 1]} : vector<8x8x64xf32> to vector<1x8x64xf32>
    %27 = vector.shape_cast %26 : vector<1x8x64xf32> to vector<8x64xf32>
    %28 = vector.extract_strided_slice %7 {offsets = [2, 0, 0], sizes = [1, 8, 64], strides = [1, 1, 1]} : vector<8x8x64xf32> to vector<1x8x64xf32>
    %29 = vector.shape_cast %28 : vector<1x8x64xf32> to vector<8x64xf32>
    %30 = arith.mulf %29, %25 : vector<8x64xf32>
    %31 = arith.addf %27, %30 : vector<8x64xf32>
    %32 = vector.extract_strided_slice %12 {offsets = [3, 0, 0], sizes = [1, 8, 64], strides = [1, 1, 1]} : vector<8x8x64xf32> to vector<1x8x64xf32>
    %33 = vector.shape_cast %32 : vector<1x8x64xf32> to vector<8x64xf32>
    %34 = vector.extract_strided_slice %7 {offsets = [3, 0, 0], sizes = [1, 8, 64], strides = [1, 1, 1]} : vector<8x8x64xf32> to vector<1x8x64xf32>
    %35 = vector.shape_cast %34 : vector<1x8x64xf32> to vector<8x64xf32>
    %36 = arith.mulf %35, %31 : vector<8x64xf32>
    %37 = arith.addf %33, %36 : vector<8x64xf32>
    %38 = vector.extract_strided_slice %12 {offsets = [4, 0, 0], sizes = [1, 8, 64], strides = [1, 1, 1]} : vector<8x8x64xf32> to vector<1x8x64xf32>
    %39 = vector.shape_cast %38 : vector<1x8x64xf32> to vector<8x64xf32>
    %40 = vector.extract_strided_slice %7 {offsets = [4, 0, 0], sizes = [1, 8, 64], strides = [1, 1, 1]} : vector<8x8x64xf32> to vector<1x8x64xf32>
    %41 = vector.shape_cast %40 : vector<1x8x64xf32> to vector<8x64xf32>
    %42 = arith.mulf %41, %37 : vector<8x64xf32>
    %43 = arith.addf %39, %42 : vector<8x64xf32>
    %44 = vector.extract_strided_slice %12 {offsets = [5, 0, 0], sizes = [1, 8, 64], strides = [1, 1, 1]} : vector<8x8x64xf32> to vector<1x8x64xf32>
    %45 = vector.shape_cast %44 : vector<1x8x64xf32> to vector<8x64xf32>
    %46 = vector.extract_strided_slice %7 {offsets = [5, 0, 0], sizes = [1, 8, 64], strides = [1, 1, 1]} : vector<8x8x64xf32> to vector<1x8x64xf32>
    %47 = vector.shape_cast %46 : vector<1x8x64xf32> to vector<8x64xf32>
    %48 = arith.mulf %47, %43 : vector<8x64xf32>
    %49 = arith.addf %45, %48 : vector<8x64xf32>
    %50 = vector.extract_strided_slice %12 {offsets = [6, 0, 0], sizes = [1, 8, 64], strides = [1, 1, 1]} : vector<8x8x64xf32> to vector<1x8x64xf32>
    %51 = vector.shape_cast %50 : vector<1x8x64xf32> to vector<8x64xf32>
    %52 = vector.extract_strided_slice %7 {offsets = [6, 0, 0], sizes = [1, 8, 64], strides = [1, 1, 1]} : vector<8x8x64xf32> to vector<1x8x64xf32>
    %53 = vector.shape_cast %52 : vector<1x8x64xf32> to vector<8x64xf32>
    %54 = arith.mulf %53, %49 : vector<8x64xf32>
    %55 = arith.addf %51, %54 : vector<8x64xf32>
    %56 = vector.shape_cast %13 : vector<8x64xf32> to vector<1x8x64xf32>
    %57 = vector.shape_cast %19 : vector<8x64xf32> to vector<1x8x64xf32>
    %58 = vector.shape_cast %25 : vector<8x64xf32> to vector<1x8x64xf32>
    %59 = vector.shape_cast %31 : vector<8x64xf32> to vector<1x8x64xf32>
    %60 = vector.shape_cast %37 : vector<8x64xf32> to vector<1x8x64xf32>
    %61 = vector.shape_cast %43 : vector<8x64xf32> to vector<1x8x64xf32>
    %62 = vector.shape_cast %49 : vector<8x64xf32> to vector<1x8x64xf32>
    %63 = vector.shape_cast %55 : vector<8x64xf32> to vector<1x8x64xf32>
    %64 = tpu.concatenate %56, %57, %58, %59, %60, %61, %62, %63 in 0 : vector<1x8x64xf32>, vector<1x8x64xf32>, vector<1x8x64xf32>, vector<1x8x64xf32>, vector<1x8x64xf32>, vector<1x8x64xf32>, vector<1x8x64xf32>, vector<1x8x64xf32> -> vector<8x8x64xf32>
    %65 = arith.mulf %64, %0 : vector<8x8x64xf32>
    %66 = tpu.concatenate %0, %65 in 2 : vector<8x8x64xf32>, vector<8x8x64xf32> -> vector<8x8x128xf32>
    %c0_8 = arith.constant 0 : index
    %c0_9 = arith.constant 0 : index
    %c0_10 = arith.constant 0 : index
    %67 = vector.load %arg10[%c0_8, %c0_9, %c0_10] : memref<8x8x128xf32, #tpu.memory_space<vmem>>, vector<8x8x128xf32>
    tpu.vector_store %arg10[%c0_8, %c0_9, %c0_10], %66 {strides = array<i32>} : memref<8x8x128xf32, #tpu.memory_space<vmem>>, vector<8x8x128xf32>,
    %68 = vector.shape_cast %66 : vector<8x8x128xf32> to vector<64x128xf32>
    %c0_11 = arith.constant 0 : index
    %c0_12 = arith.constant 0 : index
    %69 = vector.load %arg3[%c0_11, %c0_12] : memref<128x16xf32, #tpu.memory_space<vmem>>, vector<128x16xf32>
    %cst_13 = arith.constant dense<0.000000e+00> : vector<64x16xf32>
    %70 = tpu.matmul %68, %69, %cst_13 {dimension_numbers = #tpu.dot_dimension_numbers<[1], [0], [0], [1], [0, 0, 1, 1], [], []>} : vector<64x128xf32>, vector<128x16xf32>, vector<64x16xf32> -> vector<64x16xf32>
    %c0_14 = arith.constant 0 : index
    %c0_15 = arith.constant 0 : index
    %71 = vector.load %arg5[%c0_14, %c0_15] : memref<1x16xf32, #tpu.memory_space<vmem>>, vector<1x16xf32>
    %72 = vector.broadcast %71 : vector<1x16xf32> to vector<64x16xf32>
    %73 = arith.addf %70, %72 : vector<64x16xf32>
    %74 = vector.shape_cast %73 : vector<64x16xf32> to vector<8x8x16xf32>
    %c0_16 = arith.constant 0 : index
    %c0_17 = arith.constant 0 : index
    %75 = vector.load %arg4[%c0_16, %c0_17] : memref<16x16xf32, #tpu.memory_space<vmem>>, vector<16x16xf32>
    %c0_18 = arith.constant 0 : index
    %c0_19 = arith.constant 0 : index
    %76 = vector.load %arg2[%c0_18, %c0_19] : memref<8x16xf32, #tpu.memory_space<vmem>>, vector<8x16xf32>
    %77 = vector.extract_strided_slice %74 {offsets = [0, 0, 0], sizes = [1, 8, 16], strides = [1, 1, 1]} : vector<8x8x16xf32> to vector<1x8x16xf32>
    %78 = vector.shape_cast %77 : vector<1x8x16xf32> to vector<8x16xf32>
    %cst_20 = arith.constant dense<0.000000e+00> : vector<8x16xf32>
    %79 = tpu.matmul %76, %75, %cst_20 {dimension_numbers = #tpu.dot_dimension_numbers<[1], [0], [0], [1], [0, 0, 1, 1], [], []>} : vector<8x16xf32>, vector<16x16xf32>, vector<8x16xf32> -> vector<8x16xf32>
    %80 = arith.addf %78, %79 : vector<8x16xf32>
    %cst_21 = arith.constant 0.000000e+00 : f32
    %81 = vector.broadcast %cst_21 : f32 to vector<8x16xf32>
    %82 = arith.maximumf %80, %81 : vector<8x16xf32>
    %83 = vector.extract_strided_slice %74 {offsets = [1, 0, 0], sizes = [1, 8, 16], strides = [1, 1, 1]} : vector<8x8x16xf32> to vector<1x8x16xf32>
    %84 = vector.shape_cast %83 : vector<1x8x16xf32> to vector<8x16xf32>
    %cst_22 = arith.constant dense<0.000000e+00> : vector<8x16xf32>
    %85 = tpu.matmul %82, %75, %cst_22 {dimension_numbers = #tpu.dot_dimension_numbers<[1], [0], [0], [1], [0, 0, 1, 1], [], []>} : vector<8x16xf32>, vector<16x16xf32>, vector<8x16xf32> -> vector<8x16xf32>
    %86 = arith.addf %84, %85 : vector<8x16xf32>
    %cst_23 = arith.constant 0.000000e+00 : f32
    %87 = vector.broadcast %cst_23 : f32 to vector<8x16xf32>
    %88 = arith.maximumf %86, %87 : vector<8x16xf32>
    %89 = vector.extract_strided_slice %74 {offsets = [2, 0, 0], sizes = [1, 8, 16], strides = [1, 1, 1]} : vector<8x8x16xf32> to vector<1x8x16xf32>
    %90 = vector.shape_cast %89 : vector<1x8x16xf32> to vector<8x16xf32>
    %cst_24 = arith.constant dense<0.000000e+00> : vector<8x16xf32>
    %91 = tpu.matmul %88, %75, %cst_24 {dimension_numbers = #tpu.dot_dimension_numbers<[1], [0], [0], [1], [0, 0, 1, 1], [], []>} : vector<8x16xf32>, vector<16x16xf32>, vector<8x16xf32> -> vector<8x16xf32>
    %92 = arith.addf %90, %91 : vector<8x16xf32>
    %cst_25 = arith.constant 0.000000e+00 : f32
    %93 = vector.broadcast %cst_25 : f32 to vector<8x16xf32>
    %94 = arith.maximumf %92, %93 : vector<8x16xf32>
    %95 = vector.extract_strided_slice %74 {offsets = [3, 0, 0], sizes = [1, 8, 16], strides = [1, 1, 1]} : vector<8x8x16xf32> to vector<1x8x16xf32>
    %96 = vector.shape_cast %95 : vector<1x8x16xf32> to vector<8x16xf32>
    %cst_26 = arith.constant dense<0.000000e+00> : vector<8x16xf32>
    %97 = tpu.matmul %94, %75, %cst_26 {dimension_numbers = #tpu.dot_dimension_numbers<[1], [0], [0], [1], [0, 0, 1, 1], [], []>} : vector<8x16xf32>, vector<16x16xf32>, vector<8x16xf32> -> vector<8x16xf32>
    %98 = arith.addf %96, %97 : vector<8x16xf32>
    %cst_27 = arith.constant 0.000000e+00 : f32
    %99 = vector.broadcast %cst_27 : f32 to vector<8x16xf32>
    %100 = arith.maximumf %98, %99 : vector<8x16xf32>
    %101 = vector.extract_strided_slice %74 {offsets = [4, 0, 0], sizes = [1, 8, 16], strides = [1, 1, 1]} : vector<8x8x16xf32> to vector<1x8x16xf32>
    %102 = vector.shape_cast %101 : vector<1x8x16xf32> to vector<8x16xf32>
    %cst_28 = arith.constant dense<0.000000e+00> : vector<8x16xf32>
    %103 = tpu.matmul %100, %75, %cst_28 {dimension_numbers = #tpu.dot_dimension_numbers<[1], [0], [0], [1], [0, 0, 1, 1], [], []>} : vector<8x16xf32>, vector<16x16xf32>, vector<8x16xf32> -> vector<8x16xf32>
    %104 = arith.addf %102, %103 : vector<8x16xf32>
    %cst_29 = arith.constant 0.000000e+00 : f32
    %105 = vector.broadcast %cst_29 : f32 to vector<8x16xf32>
    %106 = arith.maximumf %104, %105 : vector<8x16xf32>
    %107 = vector.extract_strided_slice %74 {offsets = [5, 0, 0], sizes = [1, 8, 16], strides = [1, 1, 1]} : vector<8x8x16xf32> to vector<1x8x16xf32>
    %108 = vector.shape_cast %107 : vector<1x8x16xf32> to vector<8x16xf32>
    %cst_30 = arith.constant dense<0.000000e+00> : vector<8x16xf32>
    %109 = tpu.matmul %106, %75, %cst_30 {dimension_numbers = #tpu.dot_dimension_numbers<[1], [0], [0], [1], [0, 0, 1, 1], [], []>} : vector<8x16xf32>, vector<16x16xf32>, vector<8x16xf32> -> vector<8x16xf32>
    %110 = arith.addf %108, %109 : vector<8x16xf32>
    %cst_31 = arith.constant 0.000000e+00 : f32
    %111 = vector.broadcast %cst_31 : f32 to vector<8x16xf32>
    %112 = arith.maximumf %110, %111 : vector<8x16xf32>
    %113 = vector.extract_strided_slice %74 {offsets = [6, 0, 0], sizes = [1, 8, 16], strides = [1, 1, 1]} : vector<8x8x16xf32> to vector<1x8x16xf32>
    %114 = vector.shape_cast %113 : vector<1x8x16xf32> to vector<8x16xf32>
    %cst_32 = arith.constant dense<0.000000e+00> : vector<8x16xf32>
    %115 = tpu.matmul %112, %75, %cst_32 {dimension_numbers = #tpu.dot_dimension_numbers<[1], [0], [0], [1], [0, 0, 1, 1], [], []>} : vector<8x16xf32>, vector<16x16xf32>, vector<8x16xf32> -> vector<8x16xf32>
    %116 = arith.addf %114, %115 : vector<8x16xf32>
    %cst_33 = arith.constant 0.000000e+00 : f32
    %117 = vector.broadcast %cst_33 : f32 to vector<8x16xf32>
    %118 = arith.maximumf %116, %117 : vector<8x16xf32>
    %119 = vector.extract_strided_slice %74 {offsets = [7, 0, 0], sizes = [1, 8, 16], strides = [1, 1, 1]} : vector<8x8x16xf32> to vector<1x8x16xf32>
    %120 = vector.shape_cast %119 : vector<1x8x16xf32> to vector<8x16xf32>
    %cst_34 = arith.constant dense<0.000000e+00> : vector<8x16xf32>
    %121 = tpu.matmul %118, %75, %cst_34 {dimension_numbers = #tpu.dot_dimension_numbers<[1], [0], [0], [1], [0, 0, 1, 1], [], []>} : vector<8x16xf32>, vector<16x16xf32>, vector<8x16xf32> -> vector<8x16xf32>
    %122 = arith.addf %120, %121 : vector<8x16xf32>
    %cst_35 = arith.constant 0.000000e+00 : f32
    %123 = vector.broadcast %cst_35 : f32 to vector<8x16xf32>
    %124 = arith.maximumf %122, %123 : vector<8x16xf32>
    %125 = vector.shape_cast %82 : vector<8x16xf32> to vector<1x8x16xf32>
    %126 = vector.shape_cast %88 : vector<8x16xf32> to vector<1x8x16xf32>
    %127 = vector.shape_cast %94 : vector<8x16xf32> to vector<1x8x16xf32>
    %128 = vector.shape_cast %100 : vector<8x16xf32> to vector<1x8x16xf32>
    %129 = vector.shape_cast %106 : vector<8x16xf32> to vector<1x8x16xf32>
    %130 = vector.shape_cast %112 : vector<8x16xf32> to vector<1x8x16xf32>
    %131 = vector.shape_cast %118 : vector<8x16xf32> to vector<1x8x16xf32>
    %132 = vector.shape_cast %124 : vector<8x16xf32> to vector<1x8x16xf32>
    %133 = tpu.concatenate %125, %126, %127, %128, %129, %130, %131, %132 in 0 : vector<1x8x16xf32>, vector<1x8x16xf32>, vector<1x8x16xf32>, vector<1x8x16xf32>, vector<1x8x16xf32>, vector<1x8x16xf32>, vector<1x8x16xf32>, vector<1x8x16xf32> -> vector<8x8x16xf32>
    %c0_36 = arith.constant 0 : index
    %c0_37 = arith.constant 0 : index
    %c0_38 = arith.constant 0 : index
    %134 = vector.load %arg9[%c0_36, %c0_37, %c0_38] : memref<8x8x16xf32, #tpu.memory_space<vmem>>, vector<8x8x16xf32>
    tpu.vector_store %arg9[%c0_36, %c0_37, %c0_38], %133 {strides = array<i32>} : memref<8x8x16xf32, #tpu.memory_space<vmem>>, vector<8x8x16xf32>,
    %135 = vector.shape_cast %133 : vector<8x8x16xf32> to vector<64x16xf32>
    %c0_39 = arith.constant 0 : index
    %c0_40 = arith.constant 0 : index
    %136 = vector.load %arg6[%c0_39, %c0_40] : memref<16x1xf32, #tpu.memory_space<vmem>>, vector<16x1xf32>
    %cst_41 = arith.constant dense<0.000000e+00> : vector<64x1xf32>
    %137 = tpu.matmul %135, %136, %cst_41 {dimension_numbers = #tpu.dot_dimension_numbers<[1], [0], [0], [1], [0, 0, 1, 1], [], []>} : vector<64x16xf32>, vector<16x1xf32>, vector<64x1xf32> -> vector<64x1xf32>
    %c0_42 = arith.constant 0 : index
    %c0_43 = arith.constant 0 : index
    %138 = vector.load %arg7[%c0_42, %c0_43] : memref<1x1xf32, #tpu.memory_space<vmem>>, vector<1x1xf32>
    %139 = vector.broadcast %138 : vector<1x1xf32> to vector<64x1xf32>
    %140 = arith.addf %137, %139 : vector<64x1xf32>
    %141 = vector.shape_cast %140 : vector<64x1xf32> to vector<8x8x1xf32>
    %c0_44 = arith.constant 0 : index
    %c0_45 = arith.constant 0 : index
    %c0_46 = arith.constant 0 : index
    %142 = vector.load %arg8[%c0_44, %c0_45, %c0_46] : memref<8x8x1xf32, #tpu.memory_space<vmem>>, vector<8x8x1xf32>
    tpu.vector_store %arg8[%c0_44, %c0_45, %c0_46], %141 {strides = array<i32>} : memref<8x8x1xf32, #tpu.memory_space<vmem>>, vector<8x8x1xf32>,
    return
  }
}

</mosaic_0001>

<bundles_post_ra>
// kernel: tpu_custom_call.1
= control target key start
LH: loop header
LB: loop body
LE: loop exit
PB: predicated region body
PF: predicated region fallthrough
CT: control target
= control target key end

     0   :  { %s1675_s0 = inlined_call_operand.vmem [shape: f32[8,8,64], index: 0, kind: input, shape index: {}]   ;;  %s1676_s1 = inlined_call_operand.vmem [shape: f32[8,64], index: 1, kind: input, shape index: {}]   ;;  %s1677_s2 = inlined_call_operand.vmem [shape: f32[8,16], index: 2, kind: input, shape index: {}]   ;;  %s1678_s3 = inlined_call_operand.vmem [shape: f32[128,16], index: 3, kind: input, shape index: {}]   ;;  %s1679_s4 = inlined_call_operand.vmem [shape: f32[16,16], index: 4, kind: input, shape index: {}]   ;;  %s1680_s5 = inlined_call_operand.vmem [shape: f32[1,16], index: 5, kind: input, shape index: {}]   ;;  %s1681_s6 = inlined_call_operand.vmem [shape: f32[16,1], index: 6, kind: input, shape index: {}]   ;;  %s1682_s7 = inlined_call_operand.<no memory space> [shape: f32[1,1], index: 7, kind: input, shape index: {}]   ;;  %s1683_s8 = inlined_call_operand.vmem [shape: f32[8,8,1], index: 8, kind: output, shape index: {0}]   ;;  %s1684_s9 = inlined_call_operand.hbm [shape: f32[8,8,16], index: 9, kind: output, shape index: {1}]   ;;  %s1685_s10 = inlined_call_operand.hbm [shape: f32[8,8,128], index: 10, kind: output, shape index: {2}]  }
   0x1   :  { %v16_v0 = vstv %s1682_s7 }
   0x2   :  { %17 = vst [vmem:[#allocation2] sm:$0x1] %v16_v0 }
   0x3   :  { %18 = vsyncpa [#allocation4], 0  ;;  %v1420_v1 = vld [vmem:[%s1675_s0] sm:$0xff]  ;;  %v194_v5 = vld [vmem:[%s1678_s3 + $0x78] sm:$0xff]  ;;  %v1352_v7 = vmov 0.0   ;;  %s1353_s22 = smov 64  }
   0x4   :  { %v107_v2 = vld [vmem:[%s1676_s1] sm:$0xff]  ;;  %v44_v4 = vmul.f32 0.5, %v1420_v1  ;;  %v193_v6 = vld [vmem:[%s1678_s3 + $0x70] sm:$0xff]  ;;  %1201 = vmatprep.subr.mxu1 %v1352_v7  ;;  %1157 = vmatprep.subr.mxu0 %v194_v5  ;;  %v192_v9 = vld [vmem:[%s1678_s3 + $0x68] sm:$0xff] }
   0x5   :  { %v122_v3 = vmul.f32 %v107_v2, %v1420_v1  ;;  %1158 = vmatpush3.msra.mxu0 %v194_v5  ;;  %v191_v11 = vld [vmem:[%s1678_s3 + $0x60] sm:$0xff] }
   0x6   :  { %v51_v8 = vadd.f32 0.16666667, %v44_v4  ;;  %1159 = vmatprep.subr.mxu0 %v193_v6 }
   0x7   :  { %138 = vrot.lane.b32.xlu0 %v122_v3, %s1353_s22  ;;  %1160 = vmatpush3.msra.mxu0 %v193_v6 }
   0x8   :  { %v58_v10 = vsub.f32 0.0, %v51_v8  ;;  %1280 = vrcp.f32 %v51_v8  ;;  %1161 = vmatprep.subr.mxu0 %v192_v9 }
   0x9   :  { %19 = vsyncpa [#allocation6], 0  ;;  %1162 = vmatpush3.msra.mxu0 %v192_v9  ;;  %v190_v13 = vld [vmem:[%s1678_s3 + $0x58] sm:$0xff]  ;;  %v189_v14 = vld [vmem:[%s1678_s3 + $0x50] sm:$0xff]  ;;  %vm310_vm0 = vcmask 130048   ;;  %vm1354_vm1 = vmmov 0  }
   0xa   :  { %v65_v12 = vmul.f32 1.442695, %v58_v10  ;;  %1163 = vmatprep.subr.mxu0 %v191_v11  ;;  %v188_v15 = vld [vmem:[%s1678_s3 + $0x48] sm:$0xff]  ;;  %v187_v16 = vld [vmem:[%s1678_s3 + $0x40] sm:$0xff]  ;;  %v186_v17 = vld [vmem:[%s1678_s3 + $0x38] sm:$0xff]  ;;  %1205 = vmatprep.mubr.msk.f32.mxu1 %vm1354_vm1, %v1352_v7  ;;  %vm162_vm2 = vcmask 523264  }
   0xb   :  { %1164 = vmatpush3.msra.mxu0 %v191_v11  ;;  %v185_v18 = vld [vmem:[%s1678_s3 + $0x30] sm:$0xff]  ;;  %v1462_v19 = vld [vmem:[%s1679_s4 + $0x8] sm:$0xff]  ;;  %v1472_v22 = vld [vmem:[%s1679_s4] sm:$0xff]  ;;  %vm1036_vm3 = vcmask 7168   ;;  %s1355_s16 = smov [#allocation3]   ;;  %s1356_s18 = smov [#allocation5]  }
   0xc   :  { %1282 = vpow2.f32 %v65_v12  ;;  %1165 = vmatprep.subr.mxu0 %v190_v13  ;;  %1202 = vmatpush3.msra.mxu1 %v1462_v19  ;;  %v184_v21 = vld [vmem:[%s1678_s3 + $0x28] sm:$0xff]  ;;  %v309_v23 = vld [vmem:[%s1677_s2] sm:$0xff]  ;;  %v182_v29 = vld [vmem:[%s1678_s3 + $0x18] sm:$0xff]  ;;  %s1052_s17 = sshll.u32 %s1355_s16, 4  ;;  %s1064_s19 = sshll.u32 %s1356_s18, 4  ;;  %s1053_s17 = int_to_ptr.vmem [resolvable:$true] %s1052_s17  ;;  %s1065_s19 = int_to_ptr.vmem [resolvable:$true] %s1064_s19 }
   0xd   :  { %1166 = vmatpush3.msra.mxu0 %v190_v13  ;;  %1203 = vmatprep.subr.mxu1 %v1352_v7  ;;  %v183_v25 = vld [vmem:[%s1678_s3 + $0x20] sm:$0xff]  ;;  %v181_v31 = vld [vmem:[%s1678_s3 + $0x10] sm:$0xff]  ;;  %v37_v32 = vld [vmem:[%s1675_s0 + $0x8] sm:$0xff]  ;;  %p1313_p1 = scmp.lt.s32.totalorder %s1053_s17, %s1053_s17 }
   0xe   :  { %1167 = vmatprep.subr.mxu0 %v189_v14  ;;  %1204 = vmatpush3.msra.mxu1 %v1472_v22  ;;  %v180_v34 = vld [vmem:[%s1678_s3 + $0x8] sm:$0xff]  ;;  %v179_v36 = vld [vmem:[%s1678_s3] sm:$0xff]  ;;  %v45_v41 = vmul.f32 0.5, %v37_v32  ;;  %v38_v47 = vld [vmem:[%s1675_s0 + $0x10] sm:$0xff] }
   0xf   :  { %1168 = vmatpush3.msra.mxu0 %v189_v14  ;;  %1206 = vmatmul.mubr.msk.f32.vlgmr.msra.gmra.mxu1 %vm310_vm0, %v309_v23  ;;  %v46_v48 = vmul.f32 0.5, %v38_v47  ;;  %v1521_v6 = vld [vmem:[%s1680_s5] ss:$0 sm:$0xff]  ;;  %s1308_s5 = scalar_lea.vmem %s1053_s17, 1024 }
  0x10   :  { %1169 = vmatprep.subr.mxu0 %v188_v15  ;;  %1208 = vmatprep.subr.mxu1 %v1352_v7  ;;  %v52_v42 = vadd.f32 0.16666667, %v45_v41  ;;  %p1309_p0 = scmp.ne.s32.totalorder %s1053_s17, %s1308_s5  ;;  %p1314_p2 = scmp.lt.s32.totalorder %s1308_s5, %s1308_s5 }
  0x11   :  { %1170 = vmatpush3.msra.mxu0 %v188_v15  ;;  %1209 = vmatpush3.msra.mxu1 %v1462_v19  ;;  %v53_v49 = vadd.f32 0.16666667, %v46_v48 }
  0x12   :  { %1171 = vmatprep.subr.mxu0 %v187_v16  ;;  %1210 = vmatprep.subr.mxu1 %v1352_v7  ;;  %v59_v43 = vsub.f32 0.0, %v52_v42  ;;  %p1315_p3 = por %p1314_p2, %p1313_p1 }
  0x13   :  { %1172 = vmatpush3.msra.mxu0 %v187_v16  ;;  %1211 = vmatpush3.msra.mxu1 %v1472_v22  ;;  %v60_v50 = vsub.f32 0.0, %v53_v49 }
  0x14   :  { %1173 = vmatprep.subr.mxu0 %v186_v17  ;;  %1212 = vmatprep.mubr.msk.f32.mxu1 %vm1354_vm1, %v1352_v7  ;;  %v67_v44 = vmul.f32 1.442695, %v59_v43  ;;  %p1316_p4 = pnand %p1315_p3, %p1309_p0 }
  0x15   :  { %v1281_v20 = vpop.eup %1280  ;;  %1174 = vmatpush3.msra.mxu0 %v186_v17  ;;  %1215 = vmatprep.subr.mxu1 %v1352_v7  ;;  %v69_v51 = vmul.f32 1.442695, %v60_v50 }
  0x16   :  { %1175 = vmatprep.subr.mxu0 %v185_v18  ;;  %v80_v24 = vmul.f32 0.16666667, %v1281_v20  ;;  %1284 = vpow2.f32 %v67_v44 }
  0x17   :  { %1176 = vmatpush3.msra.mxu0 %v185_v18  ;;  %1286 = vrcp.f32 %v52_v42 }
  0x18   :  { %1177 = vmatprep.subr.mxu0 %v184_v21  ;;  %1288 = vrcp.f32 %v53_v49 }
  0x19   :  { %v1283_v26 = vpop.eup %1282  ;;  %1178 = vmatpush3.msra.mxu0 %v184_v21  ;;  %1290 = vpow2.f32 %v69_v51 }
  0x1a   :  { %v93_v27 = vsub.f32 1.0, %v1283_v26  ;;  %v108_v28 = vmul.f32 %v1283_v26, %v107_v2  ;;  %1179 = vmatprep.subr.mxu0 %v183_v25  ;;  %v39_v2 = vld [vmem:[%s1675_s0 + $0x18] sm:$0xff] }
  0x1b   :  { %1180 = vmatpush3.msra.mxu0 %v183_v25  ;;  %v47_v23 = vmul.f32 0.5, %v39_v2 }
  0x1c   :  { %v100_v30 = vmul.f32 %v93_v27, %v80_v24  ;;  %1181 = vmatprep.subr.mxu0 %v182_v29 }
  0x1d   :  { %1182 = vmatpush3.msra.mxu0 %v182_v29  ;;  %v54_v24 = vadd.f32 0.16666667, %v47_v23  ;;  %v40_v29 = vld [vmem:[%s1675_s0 + $0x20] sm:$0xff] }
  0x1e   :  { %v109_v33 = vadd.f32 %v108_v28, %v100_v30  ;;  %1183 = vmatprep.subr.mxu0 %v181_v31 }
  0x1f   :  { %1184 = vmatpush3.msra.mxu0 %v181_v31  ;;  %v61_v25 = vsub.f32 0.0, %v54_v24  ;;  %1292 = vrcp.f32 %v54_v24 }
  0x20   :  { %v123_v35 = vmul.f32 %v109_v33, %v37_v32  ;;  %1185 = vmatprep.subr.mxu0 %v180_v34 }
  0x21   :  { %1186 = vmatpush3.msra.mxu0 %v180_v34  ;;  %v71_v26 = vmul.f32 1.442695, %v61_v25 }
  0x22   :  { %140 = vrot.lane.b32.xlu0 %v123_v35, %s1353_s22  ;;  %1187 = vmatprep.subr.mxu0 %v179_v36 }
  0x23   :  { %1188 = vmatpush3.msra.mxu0 %v179_v36  ;;  %v1285_v52 = vpop.eup %1284  ;;  %1294 = vpow2.f32 %v71_v26 }
  0x24   :  { %v94_v53 = vsub.f32 1.0, %v1285_v52  ;;  %v1287_v54 = vpop.eup %1286  ;;  %v110_v56 = vmul.f32 %v1285_v52, %v109_v33  ;;  %v48_v33 = vmul.f32 0.5, %v40_v29 }
  0x25   :  { %v82_v55 = vmul.f32 0.16666667, %v1287_v54  ;;  %v1289_v58 = vpop.eup %1288 }
  0x26   :  { %v84_v61 = vmul.f32 0.16666667, %v1289_v58  ;;  %v1291_v62 = vpop.eup %1290  ;;  %v55_v35 = vadd.f32 0.16666667, %v48_v33 }
  0x27   :  { %v101_v57 = vmul.f32 %v94_v53, %v82_v55  ;;  %v95_v0 = vsub.f32 1.0, %v1291_v62 }
  0x28   :  { %1296 = vrcp.f32 %v55_v35 }
  0x29   :  { %v111_v59 = vadd.f32 %v110_v56, %v101_v57 }
  0x2b   :  { %v124_v60 = vmul.f32 %v111_v59, %v38_v47  ;;  %v112_v63 = vmul.f32 %v1291_v62, %v111_v59 }
  0x2c   :  { %v1293_v27 = vpop.eup %1292 }
  0x2d   :  { %142 = vrot.lane.b32.xlu1 %v124_v60, %s1353_s22  ;;  %v86_v30 = vmul.f32 0.16666667, %v1293_v27 }
  0x30   :  { %v1295_v28 = vpop.eup %1294 }
  0x31   :  { %v96_v31 = vsub.f32 1.0, %v1295_v28 }
  0x33   :  { %v103_v34 = vmul.f32 %v96_v31, %v86_v30  ;;  %v43_v30 = vld [vmem:[%s1675_s0 + $0x38] sm:$0xff] }
  0x79   :  { %v139_v37 = vpop.permute.xlu0 %138 }
  0x7a   :  { %v163_v38 = vsel %vm162_vm2, %v1420_v1, %v139_v37  ;;  %v102_v1 = vmul.f32 %v95_v0, %v84_v61  ;;  %v62_v37 = vsub.f32 0.0, %v55_v35 }
  0x7b   :  { %171 = vst [vmem:[#allocation5] sm:$0xff] %v163_v38  ;;  %1189 = vmatprep.mubr.f32.mxu0 %v163_v38 }
  0x7c   :  { %v113_v3 = vadd.f32 %v112_v63, %v102_v1 }
  0x7e   :  { %v125_v4 = vmul.f32 %v113_v3, %v39_v2 }
  0x80   :  { %144 = vrot.lane.b32.xlu1 %v125_v4, %s1353_s22 }
  0x94   :  { %v141_v39 = vpop.permute.xlu0 %140 }
  0x95   :  { %v164_v40 = vsel %vm162_vm2, %v37_v32, %v141_v39  ;;  %v114_v32 = vmul.f32 %v1295_v28, %v113_v3  ;;  %v73_v39 = vmul.f32 1.442695, %v62_v37 }
  0x96   :  { %172 = vst [vmem:[#allocation5 + $0x8] sm:$0xff] %v164_v40  ;;  %1190 = vmatmul.mubr.f32.vlgmr.msra.gmra.mxu0 %v164_v40  ;;  %v1297_v40 = vpop.eup %1296 }
  0x97   :  { %v115_v36 = vadd.f32 %v114_v32, %v103_v34  ;;  %1298 = vpow2.f32 %v73_v39  ;;  %v88_v41 = vmul.f32 0.16666667, %v1297_v40 }
  0x99   :  { %v126_v38 = vmul.f32 %v115_v36, %v40_v29 }
  0x9b   :  { %146 = vrot.lane.b32.xlu0 %v126_v38, %s1353_s22 }
  0x9f   :  { %v143_v12 = vpop.permute.xlu1 %142 }
  0xa0   :  { %v165_v13 = vsel %vm162_vm2, %v38_v47, %v143_v12 }
  0xa1   :  { %173 = vst [vmem:[#allocation5 + $0x10] sm:$0xff] %v165_v13  ;;  %1192 = vmatprep.mubr.f32.mxu0 %v165_v13 }
  0xa4   :  { %v1299_v42 = vpop.eup %1298 }
  0xa5   :  { %v97_v43 = vsub.f32 1.0, %v1299_v42  ;;  %v116_v44 = vmul.f32 %v1299_v42, %v115_v36 }
  0xcf   :  { %v380_v45 = vpop.f32.mrf.mxu1 }
  0xd1   :  { %v1207_v46 = vpop.f32.mrf.mxu1 }
  0xd2   :  { %v41_v46 = vld [vmem:[%s1675_s0 + $0x28] sm:$0xff] }
  0xd3   :  { %v49_v1 = vmul.f32 0.5, %v41_v46 }
  0xf2   :  { %v145_v14 = vpop.permute.xlu1 %144 }
  0xf3   :  { %v166_v15 = vsel %vm162_vm2, %v39_v2, %v145_v14  ;;  %v56_v2 = vadd.f32 0.16666667, %v49_v1 }
  0xf4   :  { %174 = vst [vmem:[#allocation5 + $0x18] sm:$0xff] %v166_v15  ;;  %1193 = vmatmul.mubr.f32.gmra.mxu0 %v166_v15 }
  0xf5   :  { %v63_v3 = vsub.f32 0.0, %v56_v2  ;;  %1300 = vrcp.f32 %v56_v2 }
  0xf7   :  { %v75_v4 = vmul.f32 1.442695, %v63_v3 }
  0xf9   :  { %1302 = vpow2.f32 %v75_v4 }
 0x10d   :  { %v147_v52 = vpop.permute.xlu0 %146 }
 0x10e   :  { %v167_v54 = vsel %vm162_vm2, %v40_v29, %v147_v52 }
 0x10f   :  { %175 = vst [vmem:[#allocation5 + $0x20] sm:$0xff] %v167_v54  ;;  %1195 = vmatprep.mubr.f32.mxu0 %v167_v54 }
 0x156   :  { %v1191_v5 = vpop.f32.mrf.mxu0 }
 0x157   :  { %v274_v16 = vadd.f32 %v1191_v5, %v1521_v6  ;;  %v1301_v5 = vpop.eup %1300 }
 0x158   :  { %v268_v8 = vpop.f32.mrf.mxu0 }
 0x159   :  { %v269_v9 = vadd.f32 %v1521_v6, %v268_v8  ;;  %v1303_v8 = vpop.eup %1302 }
 0x15a   :  { %v98_v12 = vsub.f32 1.0, %v1303_v8 }
 0x15b   :  { %v384_v10 = vadd.f32 %v380_v45, %v269_v9  ;;  %v104_v45 = vmul.f32 %v97_v43, %v88_v41  ;;  %v42_v9 = vld [vmem:[%s1675_s0 + $0x30] sm:$0xff] }
 0x15c   :  { %v50_v14 = vmul.f32 0.5, %v42_v9 }
 0x15d   :  { %v1524_v11 = vmax.f32 %v384_v10, 0.0  ;;  %v117_v47 = vadd.f32 %v116_v44, %v104_v45  ;;  %v90_v10 = vmul.f32 0.16666667, %v1301_v5 }
 0x15f   :  { %911 = vst.msk [vmem:[#allocation3] sm:$0xff] %vm310_vm0, %v1524_v11  ;;  %1213 = vmatmul.mubr.msk.f32.vlgmr.msra.gmra.mxu1 %vm310_vm0, %v1524_v11  ;;  %v127_v48 = vmul.f32 %v117_v47, %v41_v46  ;;  %v118_v13 = vmul.f32 %v1303_v8, %v117_v47  ;;  %v105_v15 = vmul.f32 %v98_v12, %v90_v10 }
 0x160   :  { %1216 = vmatpush3.msra.mxu1 %v1462_v19  ;;  %1219 = vmatprep.mubr.msk.f32.mxu1 %vm1354_vm1, %v1352_v7 }
 0x161   :  { %1217 = vmatprep.subr.mxu1 %v1352_v7  ;;  %148 = vrot.lane.b32.xlu1 %v127_v48, %s1353_s22 }
 0x162   :  { %1218 = vmatpush3.msra.mxu1 %v1472_v22 }
 0x163   :  { %1222 = vmatprep.subr.mxu1 %v1352_v7 }
 0x1b4   :  { %v1194_v49 = vpop.f32.mrf.mxu0 }
 0x1b5   :  { %v284_v60 = vadd.f32 %v1194_v49, %v1521_v6  ;;  %v920_v49 = vld [vmem:[%s1681_s6 + $0x8] sm:$0xff] }
 0x1b6   :  { %v278_v50 = vpop.f32.mrf.mxu0 }
 0x1b7   :  { %v279_v51 = vadd.f32 %v1521_v6, %v278_v50 }
 0x1d3   :  { %v149_v58 = vpop.permute.xlu1 %148 }
 0x1d4   :  { %v168_v59 = vsel %vm162_vm2, %v41_v46, %v149_v58 }
 0x1d5   :  { %176 = vst [vmem:[#allocation5 + $0x28] sm:$0xff] %v168_v59  ;;  %1196 = vmatmul.mubr.f32.gmra.mxu0 %v168_v59  ;;  %v1090_v59 = vld [vmem:[#allocation2] ss:$0 sm:$0xff] }
 0x21f   :  { %v455_v17 = vpop.f32.mrf.mxu1 }
 0x220   :  { %v459_v18 = vadd.f32 %v455_v17, %v274_v16  ;;  %v57_v16 = vadd.f32 0.16666667, %v50_v14  ;;  %v119_v17 = vadd.f32 %v118_v13, %v105_v15 }
 0x221   :  { %v1214_v20 = vpop.f32.mrf.mxu1 }
 0x222   :  { %v1539_v21 = vmax.f32 %v459_v18, 0.0  ;;  %v64_v18 = vsub.f32 0.0, %v57_v16  ;;  %1304 = vrcp.f32 %v57_v16  ;;  %v128_v20 = vmul.f32 %v119_v17, %v42_v9 }
 0x224   :  { %912 = vst.msk [vmem:[#allocation3 + $0x8] sm:$0xff] %vm310_vm0, %v1539_v21  ;;  %1220 = vmatmul.mubr.msk.f32.vlgmr.msra.gmra.mxu1 %vm310_vm0, %v1539_v21  ;;  %v77_v23 = vmul.f32 1.442695, %v64_v18  ;;  %150 = vrot.lane.b32.xlu0 %v128_v20, %s1353_s22 }
 0x225   :  { %1223 = vmatpush3.msra.mxu1 %v1462_v19  ;;  %1226 = vmatprep.mubr.msk.f32.mxu1 %vm1354_vm1, %v1352_v7 }
 0x226   :  { %1224 = vmatprep.subr.mxu1 %v1352_v7  ;;  %1306 = vpow2.f32 %v77_v23 }
 0x227   :  { %1225 = vmatpush3.msra.mxu1 %v1472_v22 }
 0x228   :  { %1229 = vmatprep.subr.mxu1 %v1352_v7 }
 0x22f   :  { %v1305_v24 = vpop.eup %1304 }
 0x230   :  { %v92_v25 = vmul.f32 0.16666667, %v1305_v24 }
 0x233   :  { %v1307_v26 = vpop.eup %1306 }
 0x234   :  { %v99_v27 = vsub.f32 1.0, %v1307_v26  ;;  %v120_v28 = vmul.f32 %v1307_v26, %v119_v17 }
 0x236   :  { %v106_v29 = vmul.f32 %v99_v27, %v92_v25 }
 0x238   :  { %v121_v31 = vadd.f32 %v120_v28, %v106_v29 }
 0x23a   :  { %v129_v32 = vmul.f32 %v121_v31, %v43_v30 }
 0x23c   :  { %152 = vrot.lane.b32.xlu1 %v129_v32, %s1353_s22 }
 0x295   :  { %v1197_v33 = vpop.f32.mrf.mxu0 }
 0x296   :  { %v151_v36 = vpop.permute.xlu0 %150  ;;  %v294_v44 = vadd.f32 %v1197_v33, %v1521_v6 }
 0x297   :  { %v288_v34 = vpop.f32.mrf.mxu0  ;;  %v169_v38 = vsel %vm162_vm2, %v42_v9, %v151_v36 }
 0x298   :  { %v289_v35 = vadd.f32 %v1521_v6, %v288_v34  ;;  %177 = vst [vmem:[#allocation5 + $0x30] sm:$0xff] %v169_v38  ;;  %1198 = vmatprep.mubr.f32.mxu0 %v169_v38 }
 0x2ae   :  { %v153_v42 = vpop.permute.xlu1 %152 }
 0x2af   :  { %v170_v43 = vsel %vm162_vm2, %v43_v30, %v153_v42 }
 0x2b0   :  { %178 = vst [vmem:[#allocation5 + $0x38] sm:$0xff] %v170_v43  ;;  %1199 = vmatmul.mubr.f32.gmra.mxu0 %v170_v43 }
 0x2e4   :  { %v530_v53 = vpop.f32.mrf.mxu1 }
 0x2e5   :  { %v534_v55 = vadd.f32 %v530_v53, %v279_v51 }
 0x2e6   :  { %v1221_v56 = vpop.f32.mrf.mxu1 }
 0x2e7   :  { %v1561_v57 = vmax.f32 %v534_v55, 0.0  ;;  %v919_v56 = vld [vmem:[%s1681_s6] sm:$0xff] }
 0x2e9   :  { %913 = vst.msk [vmem:[#allocation3 + $0x10] sm:$0xff] %vm310_vm0, %v1561_v57  ;;  %1227 = vmatmul.mubr.msk.f32.vlgmr.msra.gmra.mxu1 %vm310_vm0, %v1561_v57 }
 0x2ea   :  { %1230 = vmatpush3.msra.mxu1 %v1462_v19  ;;  %1233 = vmatprep.mubr.msk.f32.mxu1 %vm1354_vm1, %v1352_v7 }
 0x2eb   :  { %1231 = vmatprep.subr.mxu1 %v1352_v7 }
 0x2ec   :  { %1232 = vmatpush3.msra.mxu1 %v1472_v22 }
 0x2ed   :  { %1236 = vmatprep.subr.mxu1 %v1352_v7 }
 0x370   :  { %v1200_v50 = vpop.f32.mrf.mxu0 }
 0x372   :  { %v298_v51 = vpop.f32.mrf.mxu0 }
 0x373   :  { %v299_v52 = vadd.f32 %v1521_v6, %v298_v51 }
 0x3a9   :  { %v605_v61 = vpop.f32.mrf.mxu1 }
 0x3aa   :  { %v609_v62 = vadd.f32 %v605_v61, %v284_v60 }
 0x3ab   :  { %v1228_v63 = vpop.f32.mrf.mxu1 }
 0x3ac   :  { %v1575_v0 = vmax.f32 %v609_v62, 0.0 }
 0x3ae   :  { %914 = vst.msk [vmem:[#allocation3 + $0x18] sm:$0xff] %vm310_vm0, %v1575_v0  ;;  %1234 = vmatmul.mubr.msk.f32.vlgmr.msra.gmra.mxu1 %vm310_vm0, %v1575_v0 }
 0x3af   :  { %1237 = vmatpush3.msra.mxu1 %v1462_v19  ;;  %1240 = vmatprep.mubr.msk.f32.mxu1 %vm1354_vm1, %v1352_v7 }
 0x3b0   :  { %1238 = vmatprep.subr.mxu1 %v1352_v7 }
 0x3b1   :  { %1239 = vmatpush3.msra.mxu1 %v1472_v22 }
 0x3b2   :  { %1243 = vmatprep.subr.mxu1 %v1352_v7 }
 0x46e   :  { %v680_v37 = vpop.f32.mrf.mxu1 }
 0x46f   :  { %v684_v39 = vadd.f32 %v680_v37, %v289_v35 }
 0x470   :  { %v1235_v40 = vpop.f32.mrf.mxu1 }
 0x471   :  { %v685_v41 = vmax.f32 %v684_v39, 0.0 }
 0x473   :  { %915 = vst.msk [vmem:[#allocation3 + $0x20] sm:$0xff] %vm310_vm0, %v685_v41  ;;  %1241 = vmatmul.mubr.msk.f32.vlgmr.msra.gmra.mxu1 %vm310_vm0, %v685_v41 }
 0x474   :  { %1244 = vmatpush3.msra.mxu1 %v1462_v19  ;;  %1247 = vmatprep.mubr.msk.f32.mxu1 %vm1354_vm1, %v1352_v7 }
 0x475   :  { %1245 = vmatprep.subr.mxu1 %v1352_v7 }
 0x476   :  { %1246 = vmatpush3.msra.mxu1 %v1472_v22 }
 0x477   :  { %1250 = vmatprep.subr.mxu1 %v1352_v7 }
 0x533   :  { %v755_v45 = vpop.f32.mrf.mxu1 }
 0x534   :  { %v759_v46 = vadd.f32 %v755_v45, %v294_v44 }
 0x535   :  { %v1242_v47 = vpop.f32.mrf.mxu1 }
 0x536   :  { %v760_v48 = vmax.f32 %v759_v46, 0.0 }
 0x538   :  { %916 = vst.msk [vmem:[#allocation3 + $0x28] sm:$0xff] %vm310_vm0, %v760_v48  ;;  %1248 = vmatmul.mubr.msk.f32.vlgmr.msra.gmra.mxu1 %vm310_vm0, %v760_v48 }
 0x539   :  { %1251 = vmatpush3.msra.mxu1 %v1462_v19  ;;  %1254 = vmatprep.mubr.msk.f32.mxu1 %vm1354_vm1, %v1352_v7 }
 0x53a   :  { %1252 = vmatprep.subr.mxu1 %v1352_v7  ;;  %v304_v7 = vadd.f32 %v1200_v50, %v1521_v6 }
 0x53b   :  { %1253 = vmatpush3.msra.mxu1 %v1472_v22 }
 0x53c   :  { %1257 = vmatprep.subr.mxu1 %v920_v49 }
 0x5f8   :  { %v830_v53 = vpop.f32.mrf.mxu1 }
 0x5f9   :  { %v834_v54 = vadd.f32 %v830_v53, %v299_v52 }
 0x5fa   :  { %v1249_v55 = vpop.f32.mrf.mxu1 }
 0x5fb   :  { %v835_v19 = vmax.f32 %v834_v54, 0.0 }
 0x5fd   :  { %917 = vst.msk [vmem:[#allocation3 + $0x30] sm:$0xff] %vm310_vm0, %v835_v19  ;;  %1255 = vmatmul.mubr.msk.f32.vlgmr.msra.gmra.mxu1 %vm310_vm0, %v835_v19 }
 0x5fe   :  { %1258 = vmatpush3.msra.mxu1 %v920_v49  ;;  %1261 = vmatprep.mubr.msk.f32.mxu1 %vm310_vm0, %v1524_v11 }
 0x5ff   :  { %1259 = vmatprep.subr.mxu1 %v919_v56 }
 0x600   :  { %1260 = vmatpush3.msra.mxu1 %v919_v56 }
 0x601   :  { %1262 = vmatmul.mubr.msk.f32.vlgmr.msra.gmra.mxu1 %vm310_vm0, %v1539_v21 }
 0x602   :  { %1264 = vmatprep.mubr.msk.f32.mxu1 %vm310_vm0, %v1561_v57 }
 0x605   :  { %1265 = vmatmul.mubr.msk.f32.gmra.mxu1 %vm310_vm0, %v1575_v0 }
 0x606   :  { %1267 = vmatprep.mubr.msk.f32.mxu1 %vm310_vm0, %v685_v41 }
 0x609   :  { %1268 = vmatmul.mubr.msk.f32.gmra.mxu1 %vm310_vm0, %v760_v48 }
 0x60a   :  { %1270 = vmatprep.mubr.msk.f32.mxu1 %vm310_vm0, %v835_v19 }
 0x6bd   :  { %v905_v22 = vpop.f32.mrf.mxu1 }
 0x6be   :  { %v909_v11 = vadd.f32 %v905_v22, %v304_v7 }
 0x6bf   :  { %v1256_v58 = vpop.f32.mrf.mxu1 }
 0x6c0   :  { %v910_v60 = vmax.f32 %v909_v11, 0.0 }
 0x6c1   :  { %v1263_v21 = vpop.f32.mrf.mxu1 }
 0x6c2   :  { %918 = vst.msk [vmem:[#allocation3 + $0x38] sm:$0xff] %vm310_vm0, %v910_v60  ;;  %v1003_v57 = vadd.f32 %v1263_v21, %v1090_v59  ;;  %1271 = vmatmul.mubr.msk.f32.gmra.mxu1 %vm310_vm0, %v910_v60 }
 0x6c3   :  { %v997_v61 = vpop.f32.mrf.mxu1 }
 0x6c4   :  { %1038 = vst.msk [vmem:[%s1683_s8 + $0x8] sm:$0xff] %vm1036_vm3, %v1003_v57  ;;  %v998_v62 = vadd.f32 %v1090_v59, %v997_v61 }
 0x6c5   :  { %v1266_v6 = vpop.f32.mrf.mxu1 }
 0x6c6   :  { %1037 = vst.msk [vmem:[%s1683_s8] sm:$0xff] %vm1036_vm3, %v998_v62  ;;  %v1013_v63 = vadd.f32 %v1266_v6, %v1090_v59 }
 0x6c7   :  { %v1007_v0 = vpop.f32.mrf.mxu1 }
 0x6c8   :  { %1040 = vst.msk [vmem:[%s1683_s8 + $0x18] sm:$0xff] %vm1036_vm3, %v1013_v63  ;;  %v1008_v1 = vadd.f32 %v1090_v59, %v1007_v0 }
 0x6c9   :  { %v1269_v2 = vpop.f32.mrf.mxu1 }
 0x6ca   :  { %1039 = vst.msk [vmem:[%s1683_s8 + $0x10] sm:$0xff] %vm1036_vm3, %v1008_v1  ;;  %v1023_v3 = vadd.f32 %v1269_v2, %v1090_v59 }
 0x6cb   :  { %v1017_v4 = vpop.f32.mrf.mxu1 }
 0x6cc   :  { %1042 = vst.msk [vmem:[%s1683_s8 + $0x28] sm:$0xff] %vm1036_vm3, %v1023_v3  ;;  %v1018_v5 = vadd.f32 %v1090_v59, %v1017_v4 }
 0x6ce   :  { %1041 = vst.msk [vmem:[%s1683_s8 + $0x20] sm:$0xff] %vm1036_vm3, %v1018_v5 }
 0x6cf   :  { %1319 = shalt.err (!%p1316_p4)
}
 0x6d0   :  { %s1357_s20 = smov 128   ;;  %s1358_s7 = smov 8  }
 0x6d1   :  { %1058 = dma.vmem_to_hbm [thread:$0]  %s1053_s17, 1024, %s1684_s9, [#allocation4], %s1357_s20, %s1357_s20, %s1358_s7  }
 0x6d2   :  { %s1328_s23 = scalar_lea.vmem %s1065_s19, 1024  ;;  %p1333_p6 = scmp.lt.s32.totalorder %s1065_s19, %s1065_s19 }
 0x6d3   :  { %p1329_p5 = scmp.ne.s32.totalorder %s1065_s19, %s1328_s23  ;;  %p1334_p7 = scmp.lt.s32.totalorder %s1328_s23, %s1328_s23 }
 0x6d5   :  { %p1335_p8 = por %p1334_p7, %p1333_p6 }
 0x6d7   :  { %p1336_p9 = pnand %p1335_p8, %p1329_p5 }
 0x6d9   :  { %1339 = shalt.err (!%p1336_p9)
}
 0x6da   :  { %1070 = dma.vmem_to_hbm [thread:$0]  %s1065_s19, 1024, %s1685_s10, [#allocation6], %s1357_s20, %s1357_s20, %s1358_s7  }
 0x782   :  { %v1272_v8 = vpop.f32.mrf.mxu1 }
 0x783   :  { %v1033_v9 = vadd.f32 %v1272_v8, %v1090_v59 }
 0x784   :  { %v1027_v10 = vpop.f32.mrf.mxu1 }
 0x785   :  { %1044 = vst.msk [vmem:[%s1683_s8 + $0x38] sm:$0xff] %vm1036_vm3, %v1033_v9  ;;  %v1028_v12 = vadd.f32 %v1090_v59, %v1027_v10 }
 0x787   :  { %1043 = vst.msk [vmem:[%s1683_s8 + $0x30] sm:$0xff] %vm1036_vm3, %v1028_v12 }
 0x788   :  { %1348 = dma.done.wait [#allocation4], 1024  }
 0x789   :  { %1349 = vsyncadd [#allocation4], 4294966272 }
 0x78a   :  { %1350 = dma.done.wait [#allocation6], 1024  }
 0x78b   :  { %1351 = vsyncadd [#allocation6], 4294966272 }
 0x78c   :  { %1079 = vsyncpa [#allocation4], 1 }
 0x78d   :  { %1080 = vsyncpa [#allocation6], 1 }

</bundles_post_ra>
